<compile_context>
chip_gen: v5e
topology: v5e:2x2
jax: 0.10.0
libtpu: 0.0.40
codegen_flags: <defaults>
</compile_context>

<pallas_src>
import jax
import jax.numpy as jnp
from jax.experimental import pallas as pl
from jax.experimental.pallas import tpu as pltpu


def _lincomb_kernel(x_ref, cm_ref, o_ref):
    # x_ref:  (tb, K)        batch tile of x with (j, k) flattened, k fast
    # cm_ref: (K, out_dim)   scale-folded coefficient matrix (same block every step)
    # o_ref:  (tb, out_dim)
    # Single MXU contraction with f32 accumulation, written straight to the
    # output block -- no accumulator scratch, no per-step transpose/mul.
    o_ref[...] = jnp.dot(
        x_ref[...], cm_ref[...], preferred_element_type=jnp.float32
    ).astype(o_ref.dtype)


# ~2 MiB of (lane-padded) f32 x-traffic per grid step: large enough to amortize
# the ~0.35us per-step overhead, small enough that double-buffered x + out
# blocks stay far below v7x's 64 MiB VMEM.
_MAX_TB = 8192


def _pick_batch_tile(batch):
    if batch > _MAX_TB:
        # Fixed tile + pl.cdiv grid; Pallas masks the ragged last block, so a
        # non-divisible large batch never becomes a whole-batch VMEM block.
        return _MAX_TB
    # Whole batch fits one tile.  If the halves stay sublane-aligned (mult. of 8)
    # and large enough that per-step DMA still amortizes the grid-step overhead,
    # use two grid steps so the "parallel" batch axis can shard across both
    # TensorCores on v7x.
    half = batch // 2
    if half >= 1024 and half % 8 == 0:
        return half
    return batch


def _vmem_limit_bytes(tb, K, out_dim, itemsize):
    # Lane-padded footprint: minor dims (K, out_dim) round up toward 128 lanes,
    # sublane dim toward 8; every pipelined operand is double-buffered.
    lane = 128
    sub = -(-tb // 8) * 8
    x_blk = sub * (-(-K // lane) * lane) * itemsize
    o_blk = sub * (-(-out_dim // lane) * lane) * itemsize
    cm_blk = (-(-K // 8) * 8) * (-(-out_dim // lane) * lane) * 4
    total = 2 * (x_blk + o_blk + cm_blk) + (4 << 20)  # buffers + internal slack
    # >= the scoped defaults (16/32 MiB) so large tiles are accepted, and
    # <= ~48 MiB so the request is always legal on v7x (64 MiB physical VMEM).
    return int(min(max(total, 32 << 20), 48 << 20))


def linear_combination_forward(x, coef, scale_sp):
    """x: (batch, in_dim, n_coef), coef: (in_dim, out_dim, n_coef),
    scale_sp: (in_dim, out_dim) -> (batch, out_dim)."""
    batch, in_dim, n_coef = x.shape
    in_dim_c, out_dim, n_coef_c = coef.shape
    assert in_dim == in_dim_c and n_coef == n_coef_c
    assert scale_sp.shape == (in_dim, out_dim)

    K = in_dim * n_coef
    # Free (contiguous) reshape of the big input -- no HBM round trip.
    x2 = x.reshape(batch, K)
    # One-time scale fold on the (tiny) parameters, done by XLA in the wrapper:
    #   cm[j*n_coef + k, l] = coef[j, l, k] * scale_sp[j, l]
    cm = (jnp.transpose(coef, (0, 2, 1)) * scale_sp[:, None, :]).reshape(K, out_dim)
    cm = cm.astype(x.dtype)

    tb = _pick_batch_tile(batch)
    grid = (pl.cdiv(batch, tb),)

    itemsize = jnp.dtype(x.dtype).itemsize
    cost = pl.CostEstimate(
        flops=2 * batch * K * out_dim,
        transcendentals=0,
        bytes_accessed=itemsize * (batch * K + batch * out_dim + K * out_dim),
    )

    return pl.pallas_call(
        _lincomb_kernel,
        out_shape=jax.ShapeDtypeStruct((batch, out_dim), x.dtype),
        grid_spec=pltpu.PrefetchScalarGridSpec(
            num_scalar_prefetch=0,
            grid=grid,
            in_specs=[
                pl.BlockSpec((tb, K), lambda i: (i, 0)),
                # cm: same (tiny) block for every batch tile
                pl.BlockSpec((K, out_dim), lambda i: (0, 0)),
            ],
            out_specs=pl.BlockSpec((tb, out_dim), lambda i: (i, 0)),
        ),
        compiler_params=pltpu.CompilerParams(
            dimension_semantics=("parallel",),
            vmem_limit_bytes=_vmem_limit_bytes(tb, K, out_dim, itemsize),
        ),
        cost_estimate=cost,
    )(x2, cm)


if __name__ == "__main__":
    key = jax.random.PRNGKey(0)

    # Module hyper-params (small): input_dim=4, output_dim=32, num=5, k=3
    batch, in_dim, out_dim = 8, 4, 32
    num, k = 5, 3
    # grid has num + 2k + 1 knots -> n_coef = grid.shape[1] - k - 1 = num + k
    n_coef = num + k

    k_x, k_c, k_s = jax.random.split(key, 3)
    x = jax.random.normal(k_x, (batch, in_dim, n_coef), dtype=jnp.float32)

    # Parameter shapes per the module __init__ (coef via curve2coef, scale_sp=ones).
    # TODO(synk): curve2coef/B_batch pinverse-based coef init not reproduced; only
    # the forward pass matters here.  scale_sp is perturbed away from ones so the
    # wrapper-side scale fold is actually exercised by the reference check.
    coef = 0.1 * jax.random.normal(k_c, (in_dim, out_dim, n_coef), dtype=jnp.float32)
    scale_sp = 1.0 + 0.25 * jax.random.normal(k_s, (in_dim, out_dim), dtype=jnp.float32)

    y = linear_combination_forward(x, coef, scale_sp)
    y = jax.block_until_ready(y)

    # pure-JAX reference of the torch forward
    y_ref = jnp.sum(
        scale_sp[None, :, :] * jnp.einsum('ijk,jlk->ijl', x, coef), axis=1
    )
    assert y.shape == (batch, out_dim)
    assert jnp.allclose(y, y_ref, atol=1e-5, rtol=1e-5), "mismatch vs reference"
    print("KERNEL_OK")
</pallas_src>

<mosaic_0001>
module attributes {stable_mosaic.version = 11 : i64} {
  func.func @_lincomb_kernel(%arg0: i32, %arg1: memref<8x32xf32, #tpu.memory_space<vmem>>, %arg2: memref<32x32xf32, #tpu.memory_space<vmem>>, %arg3: memref<8x32xf32, #tpu.memory_space<vmem>>) attributes {dimension_semantics = [#tpu.dimension_semantics<parallel>], iteration_bounds = array<i64: 1>, scalar_prefetch = 0 : i64, scratch_operands = 0 : i64, tpu.core_type = #tpu.core_type<tc>, window_params = [{transform_indices = @transform_0, window_bounds = array<i64: 8, 32>}, {pipeline_mode = #tpu.pipeline_mode<synchronous>, transform_indices = @transform_1, window_bounds = array<i64: 32, 32>}, {transform_indices = @transform_2, window_bounds = array<i64: 8, 32>}]} {
    %c0 = arith.constant 0 : index
    %c0_0 = arith.constant 0 : index
    %0 = vector.load %arg1[%c0, %c0_0] : memref<8x32xf32, #tpu.memory_space<vmem>>, vector<8x32xf32>
    %c0_1 = arith.constant 0 : index
    %c0_2 = arith.constant 0 : index
    %1 = vector.load %arg2[%c0_1, %c0_2] : memref<32x32xf32, #tpu.memory_space<vmem>>, vector<32x32xf32>
    %cst = arith.constant dense<0.000000e+00> : vector<8x32xf32>
    %2 = tpu.matmul %0, %1, %cst {dimension_numbers = #tpu.dot_dimension_numbers<[1], [0], [0], [1], [0, 0, 1, 1], [], []>} : vector<8x32xf32>, vector<32x32xf32>, vector<8x32xf32> -> vector<8x32xf32>
    %c0_3 = arith.constant 0 : index
    %c0_4 = arith.constant 0 : index
    %3 = vector.load %arg3[%c0_3, %c0_4] : memref<8x32xf32, #tpu.memory_space<vmem>>, vector<8x32xf32>
    tpu.vector_store %arg3[%c0_3, %c0_4], %2 {strides = array<i32>} : memref<8x32xf32, #tpu.memory_space<vmem>>, vector<8x32xf32>,
    return
  }
  func.func @transform_0(%arg0: i32) -> (i32, i32) {
    %c0_i32 = arith.constant 0 : i32
    %c0_i32_0 = arith.constant 0 : i32
    return %arg0, %c0_i32 : i32, i32
  }
  func.func @transform_1(%arg0: i32) -> (i32, i32) {
    %c0_i32 = arith.constant 0 : i32
    %c0_i32_0 = arith.constant 0 : i32
    %c0_i32_1 = arith.constant 0 : i32
    return %c0_i32, %c0_i32_0 : i32, i32
  }
  func.func @transform_2(%arg0: i32) -> (i32, i32) {
    %c0_i32 = arith.constant 0 : i32
    %c0_i32_0 = arith.constant 0 : i32
    return %arg0, %c0_i32 : i32, i32
  }
}

</mosaic_0001>

<bundles_post_ra>
// kernel: tpu_custom_call.1
= control target key start
LH: loop header
LB: loop body
LE: loop exit
PB: predicated region body
PF: predicated region fallthrough
CT: control target
= control target key end

     0   :  { %7 = vsyncpa [#allocation3], 0  ;;  %s203_s0 = inlined_call_operand.hbm [shape: f32[8,32], index: 0, kind: input, shape index: {}]   ;;  %s204_s1 = inlined_call_operand.hbm [shape: f32[32,32], index: 1, kind: input, shape index: {}]   ;;  %s205_s2 = inlined_call_operand.hbm [shape: f32[8,32], index: 2, kind: output, shape index: {}]  }
   0x1   :  { %8 = vsyncpa [#allocation6], 0 }
   0x2   :  { %9 = vsyncpa [#allocation4], 0  ;;  %s15_s11 = sshll.u32 %s203_s0, 4  ;;  %s174_s12 = smov [#allocation2]   ;;  %s16_s11 = int_to_ptr.hbm [resolvable:$true] %s15_s11 }
   0x3   :  { %s17_s13 = sshll.u32 %s174_s12, 4  ;;  %s25_s16 = sshll.u32 %s204_s1, 4  ;;  %s18_s13 = int_to_ptr.vmem [resolvable:$true] %s17_s13  ;;  %s26_s16 = int_to_ptr.hbm [resolvable:$true] %s25_s16 }
   0x4   :  { %20 = dma.hbm_to_vmem [thread:$0]  %s16_s11, 128, %s18_s13, [#allocation3]  }
   0x5   :  { %s175_s17 = smov [#allocation5]   ;;  %s176_s19 = smov 128  }
   0x6   :  { %s27_s18 = sshll.u32 %s175_s17, 4  ;;  %s177_s20 = smov 8   ;;  %s28_s18 = int_to_ptr.vmem [resolvable:$true] %s27_s18 }
   0x7   :  { %33 = dma.hbm_to_vmem [thread:$0]  %s26_s16, 512, %s28_s18, [#allocation6], %s176_s19, %s176_s19, %s177_s20  }
   0x8   :  { %168 = dma.done.wait [#allocation3], 128  }
   0x9   :  { %169 = vsyncadd [#allocation3], 4294967168 }
   0xa   :  { %170 = dma.done.wait [#allocation6], 512  }
   0xb   :  { %171 = vsyncadd [#allocation6], 4294966784  ;;  %v46_v0 = vld [vmem:[#allocation5 + $0x18] sm:$0xff]  ;;  %v45_v1 = vld [vmem:[#allocation5 + $0x10] sm:$0xff]  ;;  %vm47_vm0 = vcmask 261120   ;;  %s178_s0 = smov [#allocation7]  }
   0xc   :  { %63 = vmatpush.msra.mxu0 %v46_v0  ;;  %v44_v2 = vld [vmem:[#allocation5 + $0x8] sm:$0xff]  ;;  %v43_v3 = vld [vmem:[#allocation5] sm:$0xff]  ;;  %v42_v4 = vld [vmem:[#allocation2] sm:$0xff]  ;;  %s77_s1 = sshll.u32 %s178_s0, 4  ;;  %s79_s23 = sshll.u32 %s205_s2, 4  ;;  %s78_s1 = int_to_ptr.vmem [resolvable:$true] %s77_s1  ;;  %s80_s23 = int_to_ptr.hbm [resolvable:$true] %s79_s23 }
   0xe   :  { %64 = vmatpush.msra.mxu0 %v45_v1 }
  0x10   :  { %65 = vmatpush.msra.mxu0 %v44_v2 }
  0x12   :  { %66 = vmatpush.msra.mxu0 %v43_v3 }
  0x13   :  { %90 = vmatmul.msk.f32.vlgmr.msra.gmra.mxu0 %vm47_vm0, %v42_v4 }
  0x90   :  { %v68_v5 = vpop.f32.mrf.mxu0 }
  0x91   :  { %71 = vst.msk [vmem:[#allocation7] sm:$0xff] %vm47_vm0, %v68_v5 }
  0x92   :  { %82 = dma.vmem_to_hbm [thread:$0]  %s78_s1, 128, %s80_s23, [#allocation4]  }
  0x93   :  { %172 = dma.done.wait [#allocation4], 128  }
  0x94   :  { %173 = vsyncadd [#allocation4], 4294967168 }
  0x95   :  { %87 = vsyncpa [#allocation3], 1 }
  0x96   :  { %88 = vsyncpa [#allocation6], 1 }
  0x97   :  { %89 = vsyncpa [#allocation4], 1 }

</bundles_post_ra>
